<compile_context>
chip_gen: v7x
topology: tpu7x:2x2x1
jax: 0.10.0
libtpu: 0.0.40
codegen_flags: <defaults>
</compile_context>

<pallas_src>
import math

import jax
import jax.numpy as jnp
import numpy as np
from jax.experimental import pallas as pl
from jax.experimental.pallas import tpu as pltpu

GATE = 128  # lanes per gate block == one f32 vreg of lanes (vreg-aligned gates)


def gru_encoder_kernel(xi_ref, y_ref, h_ref, w_xi_ref, w_y_ref, w_hl_ref, b_ref,
                       out_ref, hnew_ref):
    G = GATE
    H = h_ref.shape[1]
    E = out_ref.shape[1]

    h = h_ref[...]                                           # (B, H) f32 carry

    # Gate pre-activations: bf16 operands, f32 MXU accumulation.  One dot per
    # input stream -- h enters the kernel exactly once.
    gi = (jnp.dot(xi_ref[...].astype(jnp.bfloat16), w_xi_ref[...],
                  preferred_element_type=jnp.float32)
          + jnp.dot(y_ref[...].astype(jnp.bfloat16), w_y_ref[...],
                    preferred_element_type=jnp.float32))      # (B, 3G) [r|z|n]
    gh = jnp.dot(h.astype(jnp.bfloat16), w_hl_ref[:, 0:3 * G],
                 preferred_element_type=jnp.float32)          # (B, 3G) [r|z|n]

    # Every gate block starts at a vreg boundary (0, G, 2G) -> no XLU rotates;
    # all gate math below is plain (narrow) VPU/EUP work.
    rz = jax.nn.sigmoid(gi[:, 0:2 * G] + gh[:, 0:2 * G] + b_ref[:, 0:2 * G])
    r = rz[:, 0:H]
    z = rz[:, G:G + H]
    i_n = gi[:, 2 * G:2 * G + H] + b_ref[:, 2 * G:2 * G + H]
    h_n = gh[:, 2 * G:2 * G + H] + b_ref[:, 3 * G:3 * G + H]
    n = jnp.tanh(i_n + r * h_n)                # b_hn stays inside the r-gate
    h_new = (1.0 - z) * n + z * h              # f32 blend

    hnew_ref[...] = h_new
    out_ref[...] = (jnp.dot(h_new.astype(jnp.bfloat16),
                            w_hl_ref[:, 3 * G:3 * G + E],
                            preferred_element_type=jnp.float32)
                    + b_ref[:, 4 * G:4 * G + E])


def init_params(key, design_dim, observation_dim, hidden_dim, encoding_dim):
    """Deterministic init mirroring PyTorch default uniform(-1/sqrt(H), 1/sqrt(H))."""
    d_flat = design_dim[0] * design_dim[1]
    input_dim = d_flat + observation_dim
    k = 1.0 / math.sqrt(hidden_dim)
    keys = jax.random.split(key, 6)
    u = lambda kk, shape: jax.random.uniform(kk, shape, jnp.float32, -k, k)
    return {
        "weight_ih": u(keys[0], (3 * hidden_dim, input_dim)),   # torch weight_ih_l0
        "weight_hh": u(keys[1], (3 * hidden_dim, hidden_dim)),  # torch weight_hh_l0
        "bias_ih":   u(keys[2], (3 * hidden_dim,)),
        "bias_hh":   u(keys[3], (3 * hidden_dim,)),
        "linear_w":  u(keys[4], (encoding_dim, hidden_dim)),    # torch nn.Linear.weight
        "linear_b":  u(keys[5], (encoding_dim,)),
    }


def prepare_params(params, design_dim_flat):
    """One-time packing into 4 lane-blocked, pre-transposed kernel operands."""
    H = params["weight_hh"].shape[1]
    E = params["linear_w"].shape[0]
    G = GATE
    assert H <= G and E <= G

    w_ih, w_hh = params["weight_ih"], params["weight_hh"]   # (3H, in_dim), (3H, H)
    b_ih, b_hh = params["bias_ih"], params["bias_hh"]

    def lane_pad(m):                      # (rows, c<=G) -> (rows, G)
        return jnp.pad(m, ((0, 0), (0, G - m.shape[1])))

    xi_blocks, y_blocks, h_blocks = [], [], []
    for g in range(3):                    # torch gate order: r, z, n
        wi = w_ih[g * H:(g + 1) * H]      # (H, in_dim)
        wh = w_hh[g * H:(g + 1) * H]      # (H, H)
        xi_blocks.append(lane_pad(wi[:, :design_dim_flat].T))   # (d_flat, G)
        y_blocks.append(lane_pad(wi[:, design_dim_flat:].T))    # (obs,    G)
        h_blocks.append(lane_pad(wh.T))                         # (H,      G)

    w_xi = jnp.concatenate(xi_blocks, axis=1).astype(jnp.bfloat16)   # (d_flat, 3G)
    w_y = jnp.concatenate(y_blocks, axis=1).astype(jnp.bfloat16)     # (obs, 3G)
    # Hidden-side GRU weights and the Linear head share their H rows -> ONE
    # operand with columns [W_hr | W_hz | W_hn | W_lin^T]  ->  (H, 3G + E).
    w_hl = jnp.concatenate(h_blocks + [params["linear_w"].T],
                           axis=1).astype(jnp.bfloat16)

    def vec_pad(v):
        return jnp.pad(v, (0, G - v.shape[0]))
    # Single f32 bias row: [b_r | b_z | b_in | b_hn | b_lin]; r/z biases legally
    # pre-summed, b_hn kept separate (it sits inside the r-gated term).
    b_all = jnp.concatenate([
        vec_pad(b_ih[0:H] + b_hh[0:H]),
        vec_pad(b_ih[H:2 * H] + b_hh[H:2 * H]),
        vec_pad(b_ih[2 * H:3 * H]),
        vec_pad(b_hh[2 * H:3 * H]),
        params["linear_b"],
    ])[None, :].astype(jnp.float32)       # (1, 4G + E)

    return {"w_xi": w_xi, "w_y": w_y, "w_hl": w_hl, "b_all": b_all}


def _gru_encoder_step(prepared, xi, y, h):
    """One fused GRU step + Linear.  xi:(B,d0,d1) y:(B,obs) h:(1,B,H) (donated)."""
    B = xi.shape[0]
    G = GATE
    w_xi, w_y, w_hl, b_all = (prepared["w_xi"], prepared["w_y"],
                              prepared["w_hl"], prepared["b_all"])
    H = w_hl.shape[0]
    E = w_hl.shape[1] - 3 * G

    xi_flat = xi.reshape(B, -1)            # free: merges trailing dims
    h0 = h.reshape(B, H)                   # free: drops leading 1

    d_flat, obs = xi_flat.shape[1], y.shape[1]
    flops = 2 * B * (3 * G * (d_flat + obs + H) + H * E)
    bytes_accessed = (4 * (xi_flat.size + y.size + h0.size + b_all.size
                           + B * E + B * H)
                      + 2 * (w_xi.size + w_y.size + w_hl.size))
    cost = pl.CostEstimate(flops=flops, transcendentals=3 * B * H,
                           bytes_accessed=bytes_accessed)

    vmem = pl.BlockSpec(memory_space=pltpu.MemorySpace.VMEM)
    out, h_new = pl.pallas_call(
        gru_encoder_kernel,
        out_shape=(jax.ShapeDtypeStruct((B, E), jnp.float32),
                   jax.ShapeDtypeStruct((B, H), jnp.float32)),
        in_specs=[vmem] * 7,
        out_specs=(vmem, vmem),
        input_output_aliases={2: 1},       # h0 HBM buffer reused in place for h_new
        cost_estimate=cost,
    )(xi_flat, y, h0, w_xi, w_y, w_hl, b_all)

    return out, h_new.reshape(1, B, H)


# Donating h makes the pallas-level alias an actual in-place update of the
# recurrent state buffer (callers must not reuse the h they pass in).
_gru_encoder_step_jit = jax.jit(_gru_encoder_step, donate_argnums=(3,))


def gru_encoder_forward(prepared, xi, y, h=None):
    """xi: (B, d0, d1), y: (B, obs_dim), h: optional (1, B, H). Returns (x, h)."""
    if h is None:
        B = xi.shape[0]
        H = prepared["w_hl"].shape[0]
        h = jnp.zeros((1, B, H), jnp.float32)
    return _gru_encoder_step_jit(prepared, xi, y, h)


def reference_forward_f32(params, xi, y, h=None):
    """Pure-f32 JAX reference of the PyTorch GRU + Linear semantics."""
    B = xi.shape[0]
    x = jnp.concatenate([xi.reshape(B, -1), y], axis=-1).astype(jnp.float32)
    H = params["weight_hh"].shape[1]
    h0 = jnp.zeros((B, H), jnp.float32) if h is None else h.reshape(B, H).astype(jnp.float32)
    gi = x @ params["weight_ih"].T + params["bias_ih"]
    gh = h0 @ params["weight_hh"].T + params["bias_hh"]
    i_r, i_z, i_n = gi[:, :H], gi[:, H:2 * H], gi[:, 2 * H:]
    h_r, h_z, h_n = gh[:, :H], gh[:, H:2 * H], gh[:, 2 * H:]
    r = jax.nn.sigmoid(i_r + h_r)
    z = jax.nn.sigmoid(i_z + h_z)
    n = jnp.tanh(i_n + r * h_n)
    h_new = (1.0 - z) * n + z * h0
    out = h_new @ params["linear_w"].T + params["linear_b"]
    return out, h_new.reshape(1, B, H)


def reference_forward_packed(prepared, xi, y, h=None):
    """Plain-XLA replica of the exact kernel math (bf16 operands, f32 accum)."""
    G = GATE
    B = xi.shape[0]
    w_xi, w_y, w_hl, b = (prepared["w_xi"], prepared["w_y"],
                          prepared["w_hl"], prepared["b_all"])
    H = w_hl.shape[0]
    E = w_hl.shape[1] - 3 * G
    xi_flat = xi.reshape(B, -1)
    h0 = jnp.zeros((B, H), jnp.float32) if h is None else h.reshape(B, H).astype(jnp.float32)
    gi = (jnp.dot(xi_flat.astype(jnp.bfloat16), w_xi, preferred_element_type=jnp.float32)
          + jnp.dot(y.astype(jnp.bfloat16), w_y, preferred_element_type=jnp.float32))
    gh = jnp.dot(h0.astype(jnp.bfloat16), w_hl[:, :3 * G], preferred_element_type=jnp.float32)
    rz = jax.nn.sigmoid(gi[:, :2 * G] + gh[:, :2 * G] + b[:, :2 * G])
    r, z = rz[:, :H], rz[:, G:G + H]
    n = jnp.tanh(gi[:, 2 * G:2 * G + H] + b[:, 2 * G:2 * G + H]
                 + r * (gh[:, 2 * G:2 * G + H] + b[:, 3 * G:3 * G + H]))
    h_new = (1.0 - z) * n + z * h0
    out = (jnp.dot(h_new.astype(jnp.bfloat16), w_hl[:, 3 * G:3 * G + E],
                   preferred_element_type=jnp.float32) + b[:, 4 * G:4 * G + E])
    return out, h_new.reshape(1, B, H)


if __name__ == "__main__":
    design_dim = (2, 2)        # design_dim_flat = 4
    observation_dim = 4        # input_dim = 8
    hidden_dim = 32
    encoding_dim = 16
    batch = 8

    key = jax.random.PRNGKey(0)
    k_params, k_xi, k_y, k_xi2, k_y2 = jax.random.split(key, 5)

    params = init_params(k_params, design_dim, observation_dim, hidden_dim, encoding_dim)
    prepared = prepare_params(params, design_dim[0] * design_dim[1])   # pack ONCE

    xi = jax.random.normal(k_xi, (batch,) + design_dim, jnp.float32)
    y = jax.random.normal(k_y, (batch, observation_dim), jnp.float32)
    xi2 = jax.random.normal(k_xi2, (batch,) + design_dim, jnp.float32)
    y2 = jax.random.normal(k_y2, (batch, observation_dim), jnp.float32)

    # Step 1 (h = None).
    out1, h1 = gru_encoder_forward(prepared, xi, y)
    out1 = jax.block_until_ready(out1)
    h1 = jax.block_until_ready(h1)
    out1_np = np.asarray(out1)
    h1_np = np.asarray(h1)     # snapshot before h1's buffer is donated below

    # Step 2 (recurrent; h1's buffer is donated and reused in place for h2).
    out2, h2 = gru_encoder_forward(prepared, xi2, y2, h1)
    out2 = jax.block_until_ready(out2)
    h2 = jax.block_until_ready(h2)
    out2_np = np.asarray(out2)
    h2_np = np.asarray(h2)

    # Check against a plain-XLA replica of the exact kernel math.
    r_out1, r_h1 = reference_forward_packed(prepared, xi, y)
    np.testing.assert_allclose(out1_np, np.asarray(r_out1), rtol=2e-3, atol=2e-3)
    np.testing.assert_allclose(h1_np, np.asarray(r_h1), rtol=2e-3, atol=2e-3)
    r_out2, r_h2 = reference_forward_packed(prepared, xi2, y2, jnp.asarray(h1_np))
    np.testing.assert_allclose(out2_np, np.asarray(r_out2), rtol=2e-3, atol=2e-3)
    np.testing.assert_allclose(h2_np, np.asarray(r_h2), rtol=2e-3, atol=2e-3)

    # Semantic check against full-f32 PyTorch-style math (bf16-operand tolerance).
    f_out1, f_h1 = reference_forward_f32(params, xi, y)
    np.testing.assert_allclose(out1_np, np.asarray(f_out1), rtol=1e-1, atol=1e-1)
    np.testing.assert_allclose(h1_np, np.asarray(f_h1), rtol=1e-1, atol=1e-1)

    assert out1_np.shape == (batch, encoding_dim)
    assert h1_np.shape == (1, batch, hidden_dim)
    print("KERNEL_OK")
</pallas_src>

<mosaic_0001>
module attributes {stable_mosaic.version = 11 : i64} {
  func.func @gru_encoder_kernel(%arg0: memref<8x4xf32, #tpu.memory_space<vmem>>, %arg1: memref<8x4xf32, #tpu.memory_space<vmem>>, %arg2: memref<8x32xf32, #tpu.memory_space<vmem>>, %arg3: memref<4x384xbf16, #tpu.memory_space<vmem>>, %arg4: memref<4x384xbf16, #tpu.memory_space<vmem>>, %arg5: memref<32x400xbf16, #tpu.memory_space<vmem>>, %arg6: memref<1x528xf32, #tpu.memory_space<vmem>>, %arg7: memref<8x16xf32, #tpu.memory_space<vmem>>, %arg8: memref<8x32xf32, #tpu.memory_space<vmem>>) attributes {dimension_semantics = [], scalar_prefetch = 0 : i64, scratch_operands = 0 : i64, tpu.core_type = #tpu.core_type<tc>} {
    %c0 = arith.constant 0 : index
    %c0_0 = arith.constant 0 : index
    %0 = vector.load %arg2[%c0, %c0_0] : memref<8x32xf32, #tpu.memory_space<vmem>>, vector<8x32xf32>
    %c0_1 = arith.constant 0 : index
    %c0_2 = arith.constant 0 : index
    %1 = vector.load %arg0[%c0_1, %c0_2] : memref<8x4xf32, #tpu.memory_space<vmem>>, vector<8x4xf32>
    %2 = arith.truncf %1 : vector<8x4xf32> to vector<8x4xbf16>
    %c0_3 = arith.constant 0 : index
    %c0_4 = arith.constant 0 : index
    %3 = vector.load %arg3[%c0_3, %c0_4] : memref<4x384xbf16, #tpu.memory_space<vmem>>, vector<4x384xbf16>
    %cst = arith.constant dense<0.000000e+00> : vector<8x384xf32>
    %4 = tpu.matmul %2, %3, %cst {dimension_numbers = #tpu.dot_dimension_numbers<[1], [0], [0], [1], [0, 0, 1, 1], [], []>} : vector<8x4xbf16>, vector<4x384xbf16>, vector<8x384xf32> -> vector<8x384xf32>
    %c0_5 = arith.constant 0 : index
    %c0_6 = arith.constant 0 : index
    %5 = vector.load %arg1[%c0_5, %c0_6] : memref<8x4xf32, #tpu.memory_space<vmem>>, vector<8x4xf32>
    %6 = arith.truncf %5 : vector<8x4xf32> to vector<8x4xbf16>
    %c0_7 = arith.constant 0 : index
    %c0_8 = arith.constant 0 : index
    %7 = vector.load %arg4[%c0_7, %c0_8] : memref<4x384xbf16, #tpu.memory_space<vmem>>, vector<4x384xbf16>
    %cst_9 = arith.constant dense<0.000000e+00> : vector<8x384xf32>
    %8 = tpu.matmul %6, %7, %cst_9 {dimension_numbers = #tpu.dot_dimension_numbers<[1], [0], [0], [1], [0, 0, 1, 1], [], []>} : vector<8x4xbf16>, vector<4x384xbf16>, vector<8x384xf32> -> vector<8x384xf32>
    %9 = arith.addf %4, %8 : vector<8x384xf32>
    %10 = arith.truncf %0 : vector<8x32xf32> to vector<8x32xbf16>
    %c0_10 = arith.constant 0 : index
    %c0_11 = arith.constant 0 : index
    %11 = vector.load %arg5[%c0_10, %c0_11] : memref<32x400xbf16, #tpu.memory_space<vmem>>, vector<32x384xbf16>
    %cst_12 = arith.constant dense<0.000000e+00> : vector<8x384xf32>
    %12 = tpu.matmul %10, %11, %cst_12 {dimension_numbers = #tpu.dot_dimension_numbers<[1], [0], [0], [1], [0, 0, 1, 1], [], []>} : vector<8x32xbf16>, vector<32x384xbf16>, vector<8x384xf32> -> vector<8x384xf32>
    %13 = vector.extract_strided_slice %9 {offsets = [0, 0], sizes = [8, 256], strides = [1, 1]} : vector<8x384xf32> to vector<8x256xf32>
    %14 = vector.extract_strided_slice %12 {offsets = [0, 0], sizes = [8, 256], strides = [1, 1]} : vector<8x384xf32> to vector<8x256xf32>
    %15 = arith.addf %13, %14 : vector<8x256xf32>
    %c0_13 = arith.constant 0 : index
    %c0_14 = arith.constant 0 : index
    %16 = vector.load %arg6[%c0_13, %c0_14] : memref<1x528xf32, #tpu.memory_space<vmem>>, vector<1x256xf32>
    %17 = vector.broadcast %16 : vector<1x256xf32> to vector<8x256xf32>
    %18 = arith.addf %15, %17 : vector<8x256xf32>
    %19 = arith.negf %18 : vector<8x256xf32>
    %20 = math.exp %19 : vector<8x256xf32>
    %cst_15 = arith.constant 1.000000e+00 : f32
    %21 = vector.broadcast %cst_15 : f32 to vector<8x256xf32>
    %22 = arith.addf %21, %20 : vector<8x256xf32>
    %23 = arith.divf %21, %22 : vector<8x256xf32>
    %24 = vector.extract_strided_slice %23 {offsets = [0, 0], sizes = [8, 32], strides = [1, 1]} : vector<8x256xf32> to vector<8x32xf32>
    %25 = vector.extract_strided_slice %23 {offsets = [0, 128], sizes = [8, 32], strides = [1, 1]} : vector<8x256xf32> to vector<8x32xf32>
    %26 = vector.extract_strided_slice %9 {offsets = [0, 256], sizes = [8, 32], strides = [1, 1]} : vector<8x384xf32> to vector<8x32xf32>
    %c0_16 = arith.constant 0 : index
    %c256 = arith.constant 256 : index
    %27 = vector.load %arg6[%c0_16, %c256] : memref<1x528xf32, #tpu.memory_space<vmem>>, vector<1x32xf32>
    %28 = vector.broadcast %27 : vector<1x32xf32> to vector<8x32xf32>
    %29 = arith.addf %26, %28 : vector<8x32xf32>
    %30 = vector.extract_strided_slice %12 {offsets = [0, 256], sizes = [8, 32], strides = [1, 1]} : vector<8x384xf32> to vector<8x32xf32>
    %c0_17 = arith.constant 0 : index
    %c384 = arith.constant 384 : index
    %31 = vector.load %arg6[%c0_17, %c384] : memref<1x528xf32, #tpu.memory_space<vmem>>, vector<1x32xf32>
    %32 = vector.broadcast %31 : vector<1x32xf32> to vector<8x32xf32>
    %33 = arith.addf %30, %32 : vector<8x32xf32>
    %34 = arith.mulf %24, %33 : vector<8x32xf32>
    %35 = arith.addf %29, %34 : vector<8x32xf32>
    %36 = math.tanh %35 : vector<8x32xf32>
    %cst_18 = arith.constant 1.000000e+00 : f32
    %37 = vector.broadcast %cst_18 : f32 to vector<8x32xf32>
    %38 = arith.subf %37, %25 : vector<8x32xf32>
    %39 = arith.mulf %38, %36 : vector<8x32xf32>
    %40 = arith.mulf %25, %0 : vector<8x32xf32>
    %41 = arith.addf %39, %40 : vector<8x32xf32>
    %c0_19 = arith.constant 0 : index
    %c0_20 = arith.constant 0 : index
    %42 = vector.load %arg8[%c0_19, %c0_20] : memref<8x32xf32, #tpu.memory_space<vmem>>, vector<8x32xf32>
    tpu.vector_store %arg8[%c0_19, %c0_20], %41 {strides = array<i32>} : memref<8x32xf32, #tpu.memory_space<vmem>>, vector<8x32xf32>,
    %43 = arith.truncf %41 : vector<8x32xf32> to vector<8x32xbf16>
    %c0_21 = arith.constant 0 : index
    %c384_22 = arith.constant 384 : index
    %44 = vector.load %arg5[%c0_21, %c384_22] : memref<32x400xbf16, #tpu.memory_space<vmem>>, vector<32x16xbf16>
    %cst_23 = arith.constant dense<0.000000e+00> : vector<8x16xf32>
    %45 = tpu.matmul %43, %44, %cst_23 {dimension_numbers = #tpu.dot_dimension_numbers<[1], [0], [0], [1], [0, 0, 1, 1], [], []>} : vector<8x32xbf16>, vector<32x16xbf16>, vector<8x16xf32> -> vector<8x16xf32>
    %c0_24 = arith.constant 0 : index
    %c512 = arith.constant 512 : index
    %46 = vector.load %arg6[%c0_24, %c512] : memref<1x528xf32, #tpu.memory_space<vmem>>, vector<1x16xf32>
    %47 = vector.broadcast %46 : vector<1x16xf32> to vector<8x16xf32>
    %48 = arith.addf %45, %47 : vector<8x16xf32>
    %c0_25 = arith.constant 0 : index
    %c0_26 = arith.constant 0 : index
    %49 = vector.load %arg7[%c0_25, %c0_26] : memref<8x16xf32, #tpu.memory_space<vmem>>, vector<8x16xf32>
    tpu.vector_store %arg7[%c0_25, %c0_26], %48 {strides = array<i32>} : memref<8x16xf32, #tpu.memory_space<vmem>>, vector<8x16xf32>,
    return
  }
}

</mosaic_0001>

<bundles_post_ra>
// kernel: _gru_encoder_step.1
= control target key start
LH: loop header
LB: loop body
LE: loop exit
PB: predicated region body
PF: predicated region fallthrough
CT: control target
= control target key end

     0   :  { %14 = vsyncpa [#allocation3], 0  ;;  %s822_s0 = inlined_call_operand.vmem [shape: f32[8,4], index: 0, kind: input, shape index: {}]   ;;  %s823_s1 = inlined_call_operand.vmem [shape: f32[8,4], index: 1, kind: input, shape index: {}]   ;;  %s824_s2 = inlined_call_operand.vmem [shape: f32[8,32], index: 2, kind: input, shape index: {}, may-alias: {2,8}]   ;;  %s825_s3 = inlined_call_operand.vmem [shape: bf16[4,384], index: 3, kind: input, shape index: {}]   ;;  %s826_s4 = inlined_call_operand.vmem [shape: bf16[4,384], index: 4, kind: input, shape index: {}]   ;;  %s827_s5 = inlined_call_operand.hbm [shape: bf16[32,400], index: 5, kind: input, shape index: {}]   ;;  %s828_s6 = inlined_call_operand.vmem [shape: f32[1,528], index: 6, kind: input, shape index: {}]   ;;  %s829_s7 = inlined_call_operand.hbm [shape: f32[8,16], index: 7, kind: output, shape index: {0}]   ;;  %s830_s8 = inlined_call_operand.vmem [shape: f32[8,32], index: 8, kind: output, shape index: {1}, may-alias: {2,8}]  }
   0x1   :  { %15 = vsyncpa [#allocation4], 0  ;;  %s677_s27 = smov [#allocation2]   ;;  %s629_s9 = scalar_lea.hbm %s827_s5, 1024 }
   0x2   :  { %s31_s28 = sshll.u32 %s677_s27, 4  ;;  %p630_p0 = scmp.ne.s32.totalorder %s827_s5, %s629_s9  ;;  %s32_s28 = int_to_ptr.vmem [resolvable:$true] %s31_s28 }
   0x3   :  { %p633_p1 = scmp.lt.u32.totalorder %s629_s9, %s827_s5 }
   0x5   :  { %p635_p2 = pnand %p633_p1, %p630_p0 }
   0x7   :  { %638 = shalt.err (!%p635_p2)
}
   0x8   :  { %s639_s14 = scalar_lea.vmem %s32_s28, 1024  ;;  %p644_p4 = scmp.lt.s32.totalorder %s32_s28, %s32_s28 }
   0x9   :  { %p640_p3 = scmp.ne.s32.totalorder %s32_s28, %s639_s14  ;;  %p645_p5 = scmp.lt.s32.totalorder %s639_s14, %s639_s14 }
   0xb   :  { %p646_p6 = por %p645_p5, %p644_p4 }
   0xd   :  { %p647_p7 = pnand %p646_p6, %p640_p3 }
   0xf   :  { %650 = shalt.err (!%p647_p7)
}
  0x10   :  { %s678_s15 = smov 256   ;;  %s679_s16 = smov 16  }
  0x11   :  { %37 = dma.hbm_to_vmem [thread:$0]  %s827_s5, 1024, %s32_s28, [#allocation3], %s678_s15, %s678_s15, %s679_s16  }
  0x12   :  { %673 = dma.done.wait [#allocation3], 1024  }
  0x13   :  { %674 = vsyncadd [#allocation3], 4294966272  ;;  %v56_v0 = vlaneseq  ;;  %v680_v1 = vmov 1983009808   ;;  %v681_v3 = vmov 0   ;;  %v682_v5 = vmov 0.0  }
  0x14   :  { %v54_v2 = vunpack.c.l.s4 %v680_v1  ;;  %114 = vmatprep.mubr.bf16.mxu0 %v681_v3  ;;  %571 = vmatprep.subr.bf16.mxu1 %v682_v5  ;;  %vm683_vm0 = vmmov 0   ;;  %v50_v8 = vld [vmem:[%s826_s4] sm:$0x3f]  ;;  %vm72_vm1 = vcmask 1041408   ;;  %vm68_vm2 = vcmask 31744   ;;  %s684_s11 = smov [#allocation5]  }
  0x15   :  { %v742_v4 = vshrl.u32 %v56_v0, 7  ;;  %573 = vmatprep.mubr.msk.bf16.mxu1 %vm683_vm0, %v682_v5  ;;  %v47_v9 = vld [vmem:[%s825_s3] sm:$0x3f]  ;;  %v52_v12 = vcombine.high %v50_v8, %v50_v8  ;;  %v615_v29 = vld [vmem:[#allocation2 + $0x8] ss:$16 sps:$4 sm:$0xff]   ;;  %vm314_vm3 = vcmask 261120  }
  0x16   :  { %v55_v6 = vunpack.c.0.s8 %v54_v2  ;;  %v48_v13 = vld [vmem:[%s823_s1] sm:$0xff]  ;;  %v164_v14 = vcombine.high %v47_v9, %v47_v9  ;;  %v616_v32 = vld [vmem:[#allocation2 + $0x28] ss:$16 sps:$4 sm:$0xff]   ;;  %v617_v34 = vld [vmem:[#allocation2 + $0xc] ss:$16 sps:$4 sm:$0xff]   ;;  %s526_s12 = sshll.u32 %s684_s11, 4  ;;  %s527_s12 = int_to_ptr.vmem [resolvable:$true] %s526_s12 }
  0x17   :  { %v49_v19 = vpack.c.bf16 %v48_v13, %v48_v13  ;;  %v609_v22 = vld [vmem:[#allocation2 + $0x4] ss:$16 sps:$4 sm:$0xff]   ;;  %v607_v27 = vld [vmem:[#allocation2] ss:$16 sps:$4 sm:$0xff]   ;;  %v618_v35 = vld [vmem:[#allocation2 + $0x2c] ss:$16 sps:$4 sm:$0xff]   ;;  %p656_p9 = scmp.lt.s32.totalorder %s527_s12, %s527_s12 }
  0x18   :  { %v58_v7 = vsub.s32 %v55_v6, %v742_v4  ;;  %v45_v25 = vld [vmem:[%s822_s0] sm:$0xff]  ;;  %v405_v51 = vsub.s32 0, %v742_v4  ;;  %v409_v57 = vsub.s32 1, %v742_v4  ;;  %vm518_vm4 = vcmask 130048   ;;  %s651_s13 = scalar_lea.vmem %s527_s12, 128 }
  0x19   :  { %v46_v26 = vpack.c.bf16 %v45_v25, %v45_v25  ;;  %v612_v28 = vld [vmem:[#allocation2 + $0x24] ss:$16 sps:$4 sm:$0xff]   ;;  %v610_v30 = vld [vmem:[#allocation2 + $0x20] ss:$16 sps:$4 sm:$0xff]   ;;  %p652_p8 = scmp.ne.s32.totalorder %s527_s12, %s651_s13  ;;  %p657_p10 = scmp.lt.s32.totalorder %s651_s13, %s651_s13 }
  0x1a   :  { %v59_v10 = vrot.slane %v50_v8, %v58_v7  ;;  %v171_v11 = vrot.slane %v47_v9, %v58_v7  ;;  %v66_v18 = vrot.slane %v52_v12, %v58_v7  ;;  %v178_v20 = vrot.slane %v164_v14, %v58_v7  ;;  %v776_v31 = vld [vmem:[%s824_s2] sm:$0xff] }
  0x1b   :  { %v273_v33 = vpack.c.bf16 %v776_v31, %v776_v31  ;;  %v401_v54 = vld [vmem:[%s828_s6] sm:$0x3]  ;;  %v556_v13 = vld [vmem:[%s828_s6 + $0x3] ss:$0 sm:$0xff]  ;;  %p658_p11 = por %p657_p10, %p656_p9 }
  0x1c   :  { %v67_v15 = vcombine.high %v59_v10, %v59_v10  ;;  %v74_v16 = vsel %vm72_vm1, %v59_v10, 0  ;;  %v179_v17 = vcombine.high %v171_v11, %v171_v11  ;;  %v184_v21 = vsel %vm72_vm1, %v171_v11, 0 }
  0x1d   :  { %v80_v23 = vsel %vm72_vm1, %v66_v18, 0  ;;  %v190_v24 = vsel %vm72_vm1, %v178_v20, 0  ;;  %v406_v58 = vrot.slane %v401_v54, %v405_v51  ;;  %v410_v63 = vrot.slane %v401_v54, %v409_v57  ;;  %p659_p12 = pnand %p658_p11, %p652_p8 }
  0x1e   :  { %539 = vmatprep.subr.msk.bf16.mxu0 %vm72_vm1, %v67_v15  ;;  %572 = vmatpush3.bf16.msra.mxu1 %v80_v23 }
  0x1f   :  { %83 = vmatpush1.bf16.msra.mxu0 %v74_v16  ;;  %577 = vmatprep.subr.bf16.mxu1 %v682_v5  ;;  %v555_v16 = vld [vmem:[%s828_s6 + $0x2] ss:$0 sm:$0xff] }
  0x20   :  { %542 = vmatprep.subr.msk.bf16.mxu0 %vm72_vm1, %v179_v17 }
  0x21   :  { %574 = vmatmul.mubr.msk.bf16.vlgmr.msra.gmra.mrb[0].mxu1 %vm68_vm2, %v49_v19 }
  0x22   :  { %540 = vmatmul.mubr.msk.bf16.vlgmr.msra.gmra.mrb[0].mxu0 %vm68_vm2, %v49_v19  ;;  %578 = vmatpush3.bf16.msra.mxu1 %v190_v24 }
  0x23   :  { %193 = vmatpush1.bf16.msra.mxu0 %v184_v21  ;;  %224 = vmatprep.mubr.bf16.mxu0 %v681_v3 }
  0x24   :  { %318 = vmatprep.subr.bf16.mxu0 %v609_v22  ;;  %579 = vmatprep.mubr.msk.bf16.mxu1 %vm683_vm0, %v682_v5 }
  0x25   :  { %583 = vmatprep.subr.bf16.mxu1 %v682_v5 }
  0x29   :  { %580 = vmatmul.mubr.msk.bf16.vlgmr.msra.gmra.mrb[4].mxu1 %vm68_vm2, %v46_v26 }
  0x2a   :  { %543 = vmatmul.mubr.msk.bf16.vlgmr.msra.gmra.mrb[4].mxu0 %vm68_vm2, %v46_v26  ;;  %584 = vmatpush3.bf16.msra.mxu1 %v615_v29 }
  0x2b   :  { %319 = vmatpush1.bf16.msra.mxu0 %v607_v27  ;;  %350 = vmatprep.mubr.bf16.mxu0 %v681_v3 }
  0x2c   :  { %320 = vmatprep.subr.bf16.mxu0 %v612_v28  ;;  %587 = vmatprep.mubr.msk.bf16.mxu1 %vm683_vm0, %v682_v5  ;;  %v557_v28 = vld [vmem:[%s828_s6 + $0x4] ss:$0 sm:$0xff] }
  0x2d   :  { %585 = vmatprep.subr.bf16.mxu1 %v682_v5 }
  0x2e   :  { %586 = vmatpush3.bf16.msra.mxu1 %v616_v32 }
  0x2f   :  { %321 = vmatpush1.bf16.msra.mxu0 %v610_v30 }
  0x30   :  { %591 = vmatprep.subr.bf16.mxu0 %v682_v5 }
  0x31   :  { %588 = vmatmul.mubr.msk.bf16.vlgmr.msra.gmra.mrb[8].mxu1 %vm314_vm3, %v273_v33 }
  0x32   :  { %551 = vmatmul.mubr.msk.bf16.vlgmr.msra.gmra.mrb[8].mxu0 %vm314_vm3, %v273_v33 }
  0x33   :  { %595 = vmatprep.mubr.msk.bf16.mxu0 %vm683_vm0, %v682_v5  ;;  %592 = vmatpush3.bf16.msra.mxu0 %v617_v34 }
  0x34   :  { %593 = vmatprep.subr.bf16.mxu0 %v682_v5 }
  0x37   :  { %594 = vmatpush3.bf16.msra.mxu0 %v618_v35 }
  0xf4   :  { %v157_v39 = vpop.f32.mrb[0].mxu1 }
  0xf5   :  { %v116_v36 = vpop.f32.mrb[0].mxu0  ;;  %v575_v41 = vpop.f32.mrb[1].mxu1 }
  0xf6   :  { %v118_v37 = vpop.f32.mrb[1].mxu0  ;;  %v160_v42 = vpop.f32.mrb[2].mxu1 }
  0xf7   :  { %v120_v38 = vpop.f32.mrb[2].mxu0  ;;  %v576_v43 = vpop.f32.mrb[3].mxu1 }
  0xf8   :  { %v121_v40 = vpop.f32.mrb[3].mxu0 }
  0xfc   :  { %v267_v49 = vpop.f32.mrb[4].mxu1 }
  0xfd   :  { %v226_v44 = vpop.f32.mrb[4].mxu0  ;;  %v268_v52 = vadd.f32 %v267_v49, %v157_v39  ;;  %v581_v53 = vpop.f32.mrb[5].mxu1 }
  0xfe   :  { %v227_v45 = vadd.f32 %v226_v44, %v116_v36  ;;  %v228_v46 = vpop.f32.mrb[5].mxu0  ;;  %v270_v55 = vpop.f32.mrb[6].mxu1 }
  0xff   :  { %v229_v47 = vadd.f32 %v228_v46, %v118_v37  ;;  %v230_v48 = vpop.f32.mrb[6].mxu0  ;;  %v582_v56 = vpop.f32.mrb[7].mxu1  ;;  %v434_v18 = vadd.f32 %v555_v16, %v268_v52 }
 0x100   :  { %v231_v50 = vpop.f32.mrb[7].mxu0 }
 0x104   :  { %v393_v1 = vpop.f32.mrb[8].mxu1 }
 0x105   :  { %v352_v59 = vpop.f32.mrb[8].mxu0  ;;  %v589_v5 = vpop.f32.mrb[9].mxu1  ;;  %v442_v15 = vadd.f32 %v556_v13, %v393_v1 }
 0x106   :  { %v399_v60 = vadd.f32 %v352_v59, %v227_v45  ;;  %v354_v61 = vpop.f32.mrb[9].mxu0  ;;  %v396_v6 = vpop.f32.mrb[10].mxu1 }
 0x107   :  { %v400_v62 = vadd.f32 %v354_v61, %v229_v47  ;;  %v356_v0 = vpop.f32.mrb[10].mxu0  ;;  %v590_v8 = vpop.f32.mrb[11].mxu1 }
 0x108   :  { %v413_v2 = vadd.f32 %v406_v58, %v399_v60  ;;  %v357_v3 = vpop.f32.mrb[11].mxu0 }
 0x109   :  { %v414_v9 = vadd.f32 %v410_v63, %v400_v62 }
 0x10a   :  { %v553_v7 = vmul.f32 -1.442695, %v413_v2 }
 0x10b   :  { %v554_v10 = vmul.f32 -1.442695, %v414_v9 }
 0x10c   :  { %619 = vpow2.f32 %v553_v7 }
 0x10d   :  { %621 = vpow2.f32 %v554_v10 }
 0x116   :  { %v620_v11 = vpop.eup %619 }
 0x117   :  { %v421_v4 = vadd.f32 1.0, %v620_v11  ;;  %v622_v12 = vpop.eup %621 }
 0x118   :  { %v422_v14 = vadd.f32 1.0, %v622_v12 }
 0x119   :  { %623 = vrcp.f32 %v421_v4 }
 0x11a   :  { %625 = vrcp.f32 %v422_v14 }
 0x123   :  { %v624_v17 = vpop.eup %623 }
 0x124   :  { %v443_v19 = vmul.f32 %v624_v17, %v442_v15  ;;  %v626_v21 = vpop.eup %625 }
 0x125   :  { %v446_v22 = vsub.f32 1.0, %v626_v21  ;;  %v448_v25 = vmul.f32 %v626_v21, %v776_v31 }
 0x126   :  { %v444_v20 = vadd.f32 %v443_v19, %v434_v18 }
 0x128   :  { %627 = vtanh.f32 %v444_v20 }
 0x132   :  { %v628_v23 = vpop.eup %627 }
 0x133   :  { %v447_v24 = vmul.f32 %v628_v23, %v446_v22 }
 0x135   :  { %v449_v26 = vadd.f32 %v448_v25, %v447_v24 }
 0x137   :  { %450 = vst.msk [vmem:[%s830_s8] sm:$0xff] %vm314_vm3, %v449_v26  ;;  %v451_v27 = vpack.c.bf16 %v449_v26, %v449_v26 }
 0x139   :  { %596 = vmatmul.mubr.msk.bf16.vlgmr.msra.gmra.mrb[12].mxu0 %vm314_vm3, %v451_v27 }
 0x20c   :  { %v512_v29 = vpop.f32.mrb[12].mxu0 }
 0x20d   :  { %v513_v30 = vadd.f32 %v557_v28, %v512_v29  ;;  %v597_v32 = vpop.f32.mrb[13].mxu0 }
 0x20e   :  { %v515_v31 = vpop.f32.mrb[14].mxu0 }
 0x20f   :  { %v598_v33 = vpop.f32.mrb[15].mxu0  ;;  %519 = vst.msk [vmem:[#allocation5] sm:$0xff] %vm518_vm4, %v513_v30 }
 0x210   :  { %662 = shalt.err (!%p659_p12)
}
 0x211   :  { %s663_s6 = scalar_lea.hbm %s829_s7, 128 }
 0x212   :  { %p664_p13 = scmp.ne.s32.totalorder %s829_s7, %s663_s6  ;;  %p667_p0 = scmp.lt.u32.totalorder %s663_s6, %s829_s7 }
 0x214   :  { %p669_p1 = pnand %p667_p0, %p664_p13 }
 0x216   :  { %672 = shalt.err (!%p669_p1)
}
 0x217   :  { %529 = dma.vmem_to_hbm [thread:$0]  %s527_s12, 128, %s829_s7, [#allocation4]  }
 0x218   :  { %675 = dma.done.wait [#allocation4], 128  }
 0x219   :  { %676 = vsyncadd [#allocation4], 4294967168 }
 0x21a   :  { %537 = vsyncpa [#allocation3], 1 }
 0x21b   :  { %538 = vsyncpa [#allocation4], 1 }

</bundles_post_ra>
